<compile_context>
chip_gen: v7x
topology: tpu7x:2x2x1
jax: 0.10.0
libtpu: 0.0.40
codegen_flags: <defaults>
</compile_context>

<pallas_src>
import jax
import jax.numpy as jnp
import numpy as np
from jax.experimental import pallas as pl
from jax.experimental.pallas import tpu as pltpu


def _fused_dsconv_matmul_kernel(wt_ref, p_ref, b_ref, o_ref):
    # wt_ref: [Cout, K2Cp]  fused (KxK @ 1x1) weights, transposed (compute dtype)
    # p_ref : [K2Cp, TM]    im2col patch tile (lane dim = flattened N*Ho*Wo)
    # b_ref : [Cout, 1]     fused bias (f32)
    # o_ref : [Cout, TM]    lane-dense, channels-first output tile
    acc = jnp.dot(wt_ref[...], p_ref[...], preferred_element_type=jnp.float32)
    o_ref[...] = (acc + b_ref[...]).astype(o_ref.dtype)


def dsconv2d_pallas(x_nchw, w1_oihw, b1, w2_oihw, b2, stride,
                    compute_dtype=jnp.float32):
    """Forward of DSConv2d. x_nchw: [N, Cin, H, W] -> [N, Cout, Ho, Wo]."""
    N, Cin, H, W = x_nchw.shape
    KH, KW = w1_oihw.shape[2], w1_oihw.shape[3]
    Cout = w2_oihw.shape[0]
    S = stride
    Ho = (H - KH) // S + 1
    Wo = (W - KW) // S + 1
    K2C = KH * KW * Cin
    M = N * Ho * Wo

    in_bytes = jnp.dtype(compute_dtype).itemsize
    out_bytes = jnp.dtype(x_nchw.dtype).itemsize
    # Pad the contraction dim to the sublane-packing multiple of compute_dtype
    # (8 rows for f32, 16 for bf16) to avoid implicit compiler padding.
    sub = 8 * (4 // in_bytes)
    K2C_pad = pl.cdiv(K2C, sub) * sub

    # ---- algebraic fusion (groups=1, no nonlinearity between convs) ---------
    # wf[kh,kw,c,o] = sum_c1 w1[c1,c,kh,kw] * w2[o,c1];  bf = b1 @ w2 + b2
    w1_hwio = jnp.transpose(w1_oihw, (2, 3, 1, 0)).astype(jnp.float32)      # [KH,KW,Cin,Cmid]
    w2_mat = jnp.transpose(w2_oihw[:, :, 0, 0], (1, 0)).astype(jnp.float32)  # [Cmid,Cout]
    wf = jnp.tensordot(w1_hwio, w2_mat, axes=([3], [0]))                     # [KH,KW,Cin,Cout]
    wf_t = wf.reshape(K2C, Cout).T                                           # [Cout, K2C]
    wf_t = jnp.pad(wf_t, ((0, 0), (0, K2C_pad - K2C))).astype(compute_dtype)
    bf = (b1.astype(jnp.float32) @ w2_mat
          + b2.astype(jnp.float32)).reshape(Cout, 1)                         # [Cout, 1] f32

    # ---- im2col, built directly in [K2C_pad, M] (no .T, no full-slab pad) ---
    x_cnhw = jnp.transpose(x_nchw, (1, 0, 2, 3)).astype(compute_dtype)       # [Cin,N,H,W]
    rows = []
    for kh in range(KH):
        for kw in range(KW):
            tap = jax.lax.slice(
                x_cnhw,
                (0, 0, kh, kw),
                (Cin, N, kh + (Ho - 1) * S + 1, kw + (Wo - 1) * S + 1),
                (1, 1, S, S))                       # [Cin, N, Ho, Wo]
            rows.append(tap.reshape(Cin, M))        # col index = n*Ho*Wo + ho*Wo + wo
    if K2C_pad > K2C:
        rows.append(jnp.zeros((K2C_pad - K2C, M), dtype=compute_dtype))
    patches_t = jnp.concatenate(rows, axis=0)       # [K2C_pad, M], tap-major/Cin-minor

    # ---- lane-tile choice ---------------------------------------------------
    LANE = 128
    TM_CAP = 2048
    m_tiles = pl.cdiv(M, LANE)
    if m_tiles >= 2:
        # Guarantee >=2 grid steps so the "parallel" axis can shard across both
        # v7x TensorCores; the extra ~0.35us step is negligible on 1-TC chips.
        tiles_per_step = min(TM_CAP // LANE, pl.cdiv(m_tiles, 2))
    else:
        tiles_per_step = 1
    TM = tiles_per_step * LANE

    # VMEM budget (v7x scoped default is 32 MiB, physical 64 MiB): resident
    # weights + double-buffered patch/output tiles + bias.  Shrink TM if over.
    def vmem_bytes(tm):
        return (2 * Cout * K2C_pad * in_bytes        # weights (double-buffered)
                + 2 * K2C_pad * tm * in_bytes        # patch tile x2
                + 2 * Cout * tm * out_bytes          # output tile x2
                + 2 * Cout * 4)                      # bias
    VMEM_BUDGET = 24 * 1024 * 1024
    while TM > LANE and vmem_bytes(TM) > VMEM_BUDGET:
        TM = max(LANE, (TM // 2) // LANE * LANE)

    grid = (pl.cdiv(M, TM),)

    out_t = pl.pallas_call(
        _fused_dsconv_matmul_kernel,
        out_shape=jax.ShapeDtypeStruct((Cout, M), x_nchw.dtype),
        grid_spec=pltpu.PrefetchScalarGridSpec(
            num_scalar_prefetch=0,
            grid=grid,
            in_specs=[
                pl.BlockSpec((Cout, K2C_pad), lambda m: (0, 0)),  # weights, resident
                pl.BlockSpec((K2C_pad, TM), lambda m: (0, m)),    # patch tile
                pl.BlockSpec((Cout, 1), lambda m: (0, 0)),        # bias, resident
            ],
            out_specs=pl.BlockSpec((Cout, TM), lambda m: (0, m)),
        ),
        compiler_params=pltpu.CompilerParams(
            dimension_semantics=("parallel",),   # lane tiles are independent
        ),
    )(wf_t, patches_t, bf)

    # Output is already channels-first: unflatten the lane (N*Ho*Wo) dim.
    # TODO(synk): once Ho*Wo >= 128, add N as a leading grid axis and write an
    # [N, Cout, Ho*Wo] output directly to kill this epilogue relayout.
    out = out_t.reshape(Cout, N, Ho, Wo)
    return jnp.transpose(out, (1, 0, 2, 3))                       # [N, Cout, Ho, Wo]


def dsconv2d_reference(x_nchw, w1_oihw, b1, w2_oihw, b2, stride):
    """Pure-JAX reference using lax.conv_general_dilated (NCHW, like PyTorch)."""
    dn = ("NCHW", "OIHW", "NCHW")
    out = jax.lax.conv_general_dilated(
        x_nchw, w1_oihw, window_strides=(stride, stride), padding="VALID",
        dimension_numbers=dn) + b1.reshape(1, -1, 1, 1)
    out = jax.lax.conv_general_dilated(
        out, w2_oihw, window_strides=(1, 1), padding="VALID",
        dimension_numbers=dn) + b2.reshape(1, -1, 1, 1)
    return out


if __name__ == "__main__":
    # Deterministic setup consistent with DSConv2d(4, 8, kernel_size=3, stride=2)
    N, Cin, H, W = 2, 4, 16, 16
    Cout, K, stride = 8, 3, 2

    key = jax.random.PRNGKey(0)
    kx, kw1, kb1, kw2, kb2 = jax.random.split(key, 5)

    x = jax.random.normal(kx, (N, Cin, H, W), dtype=jnp.float32)
    # Parameter shapes follow nn.Conv2d: weight [out_c, in_c, kh, kw], bias [out_c]
    w1 = jax.random.normal(kw1, (Cin, Cin, K, K), dtype=jnp.float32) * 0.1
    b1 = jax.random.normal(kb1, (Cin,), dtype=jnp.float32) * 0.1
    w2 = jax.random.normal(kw2, (Cout, Cin, 1, 1), dtype=jnp.float32) * 0.1
    b2 = jax.random.normal(kb2, (Cout,), dtype=jnp.float32) * 0.1

    ref = jax.block_until_ready(dsconv2d_reference(x, w1, b1, w2, b2, stride))

    # f32 operand path: tight tolerance (fusion only reorders f32 sums).
    out = jax.block_until_ready(dsconv2d_pallas(x, w1, b1, w2, b2, stride))
    assert out.shape == (N, Cout, (H - K) // stride + 1, (W - K) // stride + 1)
    np.testing.assert_allclose(np.asarray(out), np.asarray(ref),
                               rtol=1e-4, atol=1e-4)

    # bf16 operand path (halves DMA bytes on the dominant patch slab; f32
    # accumulate + f32 bias inside the kernel): looser tolerance for bf16
    # input/weight rounding.
    out_bf16 = jax.block_until_ready(
        dsconv2d_pallas(x, w1, b1, w2, b2, stride, compute_dtype=jnp.bfloat16))
    np.testing.assert_allclose(np.asarray(out_bf16), np.asarray(ref),
                               rtol=5e-2, atol=5e-2)

    print("KERNEL_OK")
</pallas_src>

<mosaic_0001>
module attributes {stable_mosaic.version = 11 : i64} {
  func.func @_fused_dsconv_matmul_kernel(%arg0: i32, %arg1: memref<8x40xf32, #tpu.memory_space<vmem>>, %arg2: memref<40x128xf32, #tpu.memory_space<vmem>>, %arg3: memref<8x1xf32, #tpu.memory_space<vmem>>, %arg4: memref<8x128xf32, #tpu.memory_space<vmem>>) attributes {dimension_semantics = [#tpu.dimension_semantics<parallel>], iteration_bounds = array<i64: 1>, scalar_prefetch = 0 : i64, scratch_operands = 0 : i64, tpu.core_type = #tpu.core_type<tc>, window_params = [{pipeline_mode = #tpu.pipeline_mode<synchronous>, transform_indices = @transform_0, window_bounds = array<i64: 8, 40>}, {transform_indices = @transform_1, window_bounds = array<i64: 40, 128>}, {pipeline_mode = #tpu.pipeline_mode<synchronous>, transform_indices = @transform_2, window_bounds = array<i64: 8, 1>}, {transform_indices = @transform_3, window_bounds = array<i64: 8, 128>}]} {
    %c0 = arith.constant 0 : index
    %c0_0 = arith.constant 0 : index
    %0 = vector.load %arg1[%c0, %c0_0] : memref<8x40xf32, #tpu.memory_space<vmem>>, vector<8x40xf32>
    %c0_1 = arith.constant 0 : index
    %c0_2 = arith.constant 0 : index
    %1 = vector.load %arg2[%c0_1, %c0_2] : memref<40x128xf32, #tpu.memory_space<vmem>>, vector<40x128xf32>
    %cst = arith.constant dense<0.000000e+00> : vector<8x128xf32>
    %2 = tpu.matmul %0, %1, %cst {dimension_numbers = #tpu.dot_dimension_numbers<[1], [0], [0], [1], [0, 0, 1, 1], [], []>} : vector<8x40xf32>, vector<40x128xf32>, vector<8x128xf32> -> vector<8x128xf32>
    %c0_3 = arith.constant 0 : index
    %c0_4 = arith.constant 0 : index
    %3 = vector.load %arg3[%c0_3, %c0_4] : memref<8x1xf32, #tpu.memory_space<vmem>>, vector<8x1xf32>
    %4 = vector.broadcast %3 : vector<8x1xf32> to vector<8x128xf32>
    %5 = arith.addf %2, %4 : vector<8x128xf32>
    %c0_5 = arith.constant 0 : index
    %c0_6 = arith.constant 0 : index
    %6 = vector.load %arg4[%c0_5, %c0_6] : memref<8x128xf32, #tpu.memory_space<vmem>>, vector<8x128xf32>
    tpu.vector_store %arg4[%c0_5, %c0_6], %5 {strides = array<i32>} : memref<8x128xf32, #tpu.memory_space<vmem>>, vector<8x128xf32>,
    return
  }
  func.func @transform_0(%arg0: i32) -> (i32, i32) {
    %c0_i32 = arith.constant 0 : i32
    %c0_i32_0 = arith.constant 0 : i32
    %c0_i32_1 = arith.constant 0 : i32
    return %c0_i32, %c0_i32_0 : i32, i32
  }
  func.func @transform_1(%arg0: i32) -> (i32, i32) {
    %c0_i32 = arith.constant 0 : i32
    %c0_i32_0 = arith.constant 0 : i32
    return %c0_i32, %arg0 : i32, i32
  }
  func.func @transform_2(%arg0: i32) -> (i32, i32) {
    %c0_i32 = arith.constant 0 : i32
    %c0_i32_0 = arith.constant 0 : i32
    %c0_i32_1 = arith.constant 0 : i32
    return %c0_i32, %c0_i32_0 : i32, i32
  }
  func.func @transform_3(%arg0: i32) -> (i32, i32) {
    %c0_i32 = arith.constant 0 : i32
    %c0_i32_0 = arith.constant 0 : i32
    return %c0_i32, %arg0 : i32, i32
  }
}

</mosaic_0001>

<bundles_post_ra>
// kernel: tpu_custom_call.1
= control target key start
LH: loop header
LB: loop body
LE: loop exit
PB: predicated region body
PF: predicated region fallthrough
CT: control target
= control target key end

     0   :  { %8 = vsyncpa [#allocation3], 0  ;;  %s272_s0 = inlined_call_operand.vmem [shape: f32[8,40], index: 0, kind: input, shape index: {}]   ;;  %s273_s1 = inlined_call_operand.hbm [shape: f32[40,98], index: 1, kind: input, shape index: {}]   ;;  %s274_s2 = inlined_call_operand.vmem [shape: f32[8,1], index: 2, kind: input, shape index: {}]   ;;  %s275_s3 = inlined_call_operand.hbm [shape: f32[8,98], index: 3, kind: output, shape index: {}]  }
   0x1   :  { %9 = vsyncpa [#allocation4], 0  ;;  %s214_s12 = smov [#allocation2]   ;;  %s166_s16 = scalar_lea.hbm %s273_s1, 640 }
   0x2   :  { %s17_s13 = sshll.u32 %s214_s12, 4  ;;  %p167_p0 = scmp.ne.s32.totalorder %s273_s1, %s166_s16  ;;  %s18_s13 = int_to_ptr.vmem [resolvable:$true] %s17_s13 }
   0x3   :  { %p170_p1 = scmp.lt.u32.totalorder %s166_s16, %s273_s1 }
   0x5   :  { %p172_p2 = pnand %p170_p1, %p167_p0 }
   0x7   :  { %175 = shalt.err (!%p172_p2)
}
   0x8   :  { %s176_s21 = scalar_lea.vmem %s18_s13, 640  ;;  %p181_p4 = scmp.lt.s32.totalorder %s18_s13, %s18_s13 }
   0x9   :  { %p177_p3 = scmp.ne.s32.totalorder %s18_s13, %s176_s21  ;;  %p182_p5 = scmp.lt.s32.totalorder %s176_s21, %s176_s21 }
   0xb   :  { %p183_p6 = por %p182_p5, %p181_p4 }
   0xd   :  { %p184_p7 = pnand %p183_p6, %p177_p3 }
   0xf   :  { %187 = shalt.err (!%p184_p7)
}
  0x10   :  { %s215_s22 = smov 128   ;;  %s216_s23 = smov 8  }
  0x11   :  { %23 = dma.hbm_to_vmem [thread:$0]  %s273_s1, 640, %s18_s13, [#allocation3], %s215_s22, %s215_s22, %s216_s23  }
  0x12   :  { %210 = dma.done.wait [#allocation3], 640  }
  0x13   :  { %211 = vsyncadd [#allocation3], 4294966656  ;;  %v217_v0 = vmov 0.0|0.0   ;;  %vm218_vm0 = vmmov 0   ;;  %v219_v1 = vmov 0.0   ;;  %v220_v2 = vmov 0  }
  0x14   :  { %151 = vmatprep.subr.bf16.mxu0 %v217_v0  ;;  %148 = vmatprep.mubr.msk.f32.mxu0 %vm218_vm0, %v219_v1  ;;  %v30_v3 = vld [vmem:[#allocation2] sm:$0xff]  ;;  %v31_v4 = vld [vmem:[#allocation2 + $0x8] sm:$0xff]  ;;  %v32_v5 = vld [vmem:[#allocation2 + $0x10] sm:$0xff]  ;;  %vm41_vm1 = vcmask 326656   ;;  %s221_s29 = smov [#allocation5]  }
  0x15   :  { %165 = vset.pattern.permute.xlu0 %v220_v2  ;;  %v152_v6 = vpack.c.bf16 %v31_v4, %v30_v3  ;;  %v33_v7 = vld [vmem:[#allocation2 + $0x18] sm:$0xff]  ;;  %v35_v8 = vld [vmem:[%s274_s2] sm:$0xff]  ;;  %s122_s30 = sshll.u32 %s221_s29, 4  ;;  %s123_s30 = int_to_ptr.vmem [resolvable:$true] %s122_s30 }
  0x16   :  { %v155_v9 = vpack.c.bf16 %v33_v7, %v32_v5  ;;  %38 = vperm.xlu0 %165, %v35_v8   ;;  %v34_v10 = vld [vmem:[#allocation2 + $0x20] sm:$0xff]  ;;  %s188_s2 = scalar_lea.vmem %s123_s30, 128  ;;  %p193_p9 = scmp.lt.s32.totalorder %s123_s30, %s123_s30 }
  0x17   :  { %153 = vmatpush3.bf16.msra.mxu0 %v152_v6  ;;  %v29_v11 = vld [vmem:[%s272_s0] sm:$0xff]  ;;  %p189_p8 = scmp.ne.s32.totalorder %s123_s30, %s188_s2  ;;  %p194_p10 = scmp.lt.s32.totalorder %s188_s2, %s188_s2 }
  0x18   :  { %154 = vmatprep.subr.bf16.mxu0 %v217_v0 }
  0x19   :  { %p195_p11 = por %p194_p10, %p193_p9 }
  0x1b   :  { %156 = vmatpush3.bf16.msra.mxu0 %v155_v9  ;;  %p196_p12 = pnand %p195_p11, %p189_p8 }
  0x1c   :  { %146 = vmatprep.subr.mxu0 %v219_v1 }
  0x1f   :  { %147 = vmatpush3.msra.mxu0 %v34_v10 }
  0x20   :  { %149 = vmatmul.mubr.msk.f32.vlgmr.msra.gmra.mrb[0].mxu0 %vm41_vm1, %v29_v11 }
  0x95   :  { %v39_v12 = vpop.permute.xlu0 %38 }
  0xf3   :  { %v111_v13 = vpop.f32.mrb[0].mxu0 }
  0xf4   :  { %v112_v14 = vadd.f32 %v111_v13, %v39_v12  ;;  %v150_v15 = vpop.f32.mrb[1].mxu0 }
  0xf6   :  { %115 = vst [vmem:[#allocation5] sm:$0xff] %v112_v14 }
  0xf7   :  { %199 = shalt.err (!%p196_p12)
}
  0xf8   :  { %s200_s5 = scalar_lea.hbm %s275_s3, 128 }
  0xf9   :  { %p201_p13 = scmp.ne.s32.totalorder %s275_s3, %s200_s5  ;;  %p204_p0 = scmp.lt.u32.totalorder %s200_s5, %s275_s3 }
  0xfb   :  { %p206_p1 = pnand %p204_p0, %p201_p13 }
  0xfd   :  { %209 = shalt.err (!%p206_p1)
}
  0xfe   :  { %125 = dma.vmem_to_hbm [thread:$0]  %s123_s30, 128, %s275_s3, [#allocation4]  }
  0xff   :  { %212 = dma.done.wait [#allocation4], 128  }
 0x100   :  { %213 = vsyncadd [#allocation4], 4294967168 }
 0x101   :  { %129 = vsyncpa [#allocation3], 1 }
 0x102   :  { %130 = vsyncpa [#allocation4], 1 }

</bundles_post_ra>
